<compile_context>
chip_gen: v7x
topology: tpu7x:2x2x1
jax: 0.10.0
libtpu: 0.0.40
codegen_flags: <defaults>
</compile_context>

<pallas_src>
import jax
import jax.numpy as jnp
from jax.experimental import pallas as pl
from jax.experimental.pallas import tpu as pltpu


def _implicitm_kernel(x_ref, s_ref, o_ref):
    # x_ref: (TILE_R, TILE_C) tile of the flattened input
    # s_ref: (TILE_R, 1)      per-row scale (implicit param broadcast over N)
    # o_ref: (TILE_R, TILE_C) output tile
    o_ref[...] = (x_ref[...] * s_ref[...]).astype(o_ref.dtype)


def _sublane_multiple(dtype) -> int:
    # Sublane packing: 8 rows for 4-byte, 16 for 2-byte, 32 for 1-byte dtypes.
    return {4: 8, 2: 16, 1: 32}.get(jnp.dtype(dtype).itemsize, 8)


def _round_up(x, m):
    return ((x + m - 1) // m) * m


def implicit_m(x, implicit, *, target_tile_bytes=2 * 1024 * 1024,
               max_tile_cols=2048):
    """Applies out = implicit * x.

    x:        (N, C, H, W)  float input
    implicit: (1, C, 1, 1)  learned per-channel scale
    """
    N, C, H, W = x.shape
    assert implicit.shape == (1, C, 1, 1)
    HW = H * W
    R = N * C

    # Match PyTorch's type promotion for the result dtype.
    out_dtype = jnp.promote_types(x.dtype, implicit.dtype)

    itemsize = jnp.dtype(x.dtype).itemsize
    sub = _sublane_multiple(x.dtype)

    # Column (lane) tile: full H*W if it is small enough (full-dim block is
    # always legal, even when not a multiple of 128); otherwise a large
    # 128-multiple block -- the ragged tail is masked by Pallas.
    tile_c = HW if HW <= max_tile_cols else max_tile_cols

    # Row (sublane) tile: aim for ~target_tile_bytes of data per tile,
    # rounded to the dtype's sublane packing, capped by the row count.
    tile_r = max(sub, (target_tile_bytes // (tile_c * itemsize)) // sub * sub)
    tile_r = min(tile_r, _round_up(R, sub))

    grid = (pl.cdiv(R, tile_r), pl.cdiv(HW, tile_c))

    # Flatten: one row per (n, c) plane; per-row scale column (tiny: R elems).
    x2d = x.reshape(R, HW)
    scale = jnp.broadcast_to(implicit.reshape(1, C), (N, C)).reshape(R, 1)

    out2d = pl.pallas_call(
        _implicitm_kernel,
        out_shape=jax.ShapeDtypeStruct((R, HW), out_dtype),
        grid_spec=pltpu.PrefetchScalarGridSpec(
            num_scalar_prefetch=0,
            grid=grid,
            in_specs=[
                pl.BlockSpec((tile_r, tile_c), lambda i, j: (i, j)),
                # Scale depends only on the row block -> no re-DMA while the
                # inner column axis sweeps; footprint stays bounded.
                pl.BlockSpec((tile_r, 1), lambda i, j: (i, 0)),
            ],
            out_specs=pl.BlockSpec((tile_r, tile_c), lambda i, j: (i, j)),
        ),
        compiler_params=pltpu.CompilerParams(
            dimension_semantics=("parallel", "parallel"),
            # Double-buffered in/out tiles (~2 MiB each) + small scale buffers
            # stay well under this on every generation (incl. v7x's 64 MiB).
            vmem_limit_bytes=32 * 1024 * 1024,
        ),
    )(x2d, scale)

    return out2d.reshape(N, C, H, W)


def init_implicit(key, channel, mean=1.0, std=0.02, dtype=jnp.float32):
    # nn.init.normal_(torch.ones(1, C, 1, 1), mean, std)
    return mean + std * jax.random.normal(key, (1, channel, 1, 1), dtype=dtype)


if __name__ == "__main__":
    key = jax.random.PRNGKey(0)
    k_x, k_w = jax.random.split(key)

    # Primary small test: matches the module's typical NCHW use.
    N, C, H, W = 2, 4, 16, 16
    x = jax.random.normal(k_x, (N, C, H, W), dtype=jnp.float32)
    implicit = init_implicit(k_w, C)

    out = jax.block_until_ready(implicit_m(x, implicit))
    ref = implicit * x
    assert out.shape == (N, C, H, W)
    assert jnp.allclose(out, ref, atol=1e-6, rtol=1e-6)

    # Larger spatial map: exercises the column-blocked (2-step) grid path.
    x2 = jax.random.normal(k_x, (2, 4, 64, 64), dtype=jnp.float32)
    out2 = jax.block_until_ready(implicit_m(x2, implicit))
    assert jnp.allclose(out2, implicit * x2, atol=1e-6, rtol=1e-6)

    # Non-128-multiple spatial size (14x14): full-dim lane block path.
    x3 = jax.random.normal(k_w, (2, 4, 14, 14), dtype=jnp.float32)
    out3 = jax.block_until_ready(implicit_m(x3, implicit))
    assert jnp.allclose(out3, implicit * x3, atol=1e-6, rtol=1e-6)

    print("KERNEL_OK")
</pallas_src>

<mosaic_0001>
module attributes {stable_mosaic.version = 11 : i64} {
  func.func @_implicitm_kernel(%arg0: i32, %arg1: i32, %arg2: memref<8x256xf32, #tpu.memory_space<vmem>>, %arg3: memref<8x1xf32, #tpu.memory_space<vmem>>, %arg4: memref<8x256xf32, #tpu.memory_space<vmem>>) attributes {dimension_semantics = [#tpu.dimension_semantics<parallel>, #tpu.dimension_semantics<parallel>], iteration_bounds = array<i64: 1, 1>, scalar_prefetch = 0 : i64, scratch_operands = 0 : i64, tpu.core_type = #tpu.core_type<tc>, window_params = [{transform_indices = @transform_0, window_bounds = array<i64: 8, 256>}, {transform_indices = @transform_1, window_bounds = array<i64: 8, 1>}, {transform_indices = @transform_2, window_bounds = array<i64: 8, 256>}]} {
    %c0 = arith.constant 0 : index
    %c0_0 = arith.constant 0 : index
    %0 = vector.load %arg2[%c0, %c0_0] : memref<8x256xf32, #tpu.memory_space<vmem>>, vector<8x256xf32>
    %c0_1 = arith.constant 0 : index
    %c0_2 = arith.constant 0 : index
    %1 = vector.load %arg3[%c0_1, %c0_2] : memref<8x1xf32, #tpu.memory_space<vmem>>, vector<8x1xf32>
    %2 = vector.broadcast %1 : vector<8x1xf32> to vector<8x256xf32>
    %3 = arith.mulf %0, %2 : vector<8x256xf32>
    %c0_3 = arith.constant 0 : index
    %c0_4 = arith.constant 0 : index
    %4 = vector.load %arg4[%c0_3, %c0_4] : memref<8x256xf32, #tpu.memory_space<vmem>>, vector<8x256xf32>
    tpu.vector_store %arg4[%c0_3, %c0_4], %3 {strides = array<i32>} : memref<8x256xf32, #tpu.memory_space<vmem>>, vector<8x256xf32>,
    return
  }
  func.func @transform_0(%arg0: i32, %arg1: i32) -> (i32, i32) {
    %c0_i32 = arith.constant 0 : i32
    return %arg0, %arg1 : i32, i32
  }
  func.func @transform_1(%arg0: i32, %arg1: i32) -> (i32, i32) {
    %c0_i32 = arith.constant 0 : i32
    %c0_i32_0 = arith.constant 0 : i32
    return %arg0, %c0_i32 : i32, i32
  }
  func.func @transform_2(%arg0: i32, %arg1: i32) -> (i32, i32) {
    %c0_i32 = arith.constant 0 : i32
    return %arg0, %arg1 : i32, i32
  }
}

</mosaic_0001>

<bundles_post_ra>
// kernel: tpu_custom_call.1
= control target key start
LH: loop header
LB: loop body
LE: loop exit
PB: predicated region body
PF: predicated region fallthrough
CT: control target
= control target key end

     0   :  { %7 = vsyncpa [#allocation3], 0  ;;  %s148_s0 = inlined_call_operand.hbm [shape: f32[8,256], index: 0, kind: input, shape index: {}]   ;;  %s149_s1 = inlined_call_operand.vmem [shape: f32[8,1], index: 1, kind: input, shape index: {}]   ;;  %s150_s2 = inlined_call_operand.hbm [shape: f32[8,256], index: 2, kind: output, shape index: {}]  }
   0x1   :  { %8 = vsyncpa [#allocation4], 0  ;;  %s103_s9 = smov [#allocation2]   ;;  %s55_s13 = scalar_lea.hbm %s148_s0, 256 }
   0x2   :  { %s15_s10 = sshll.u32 %s103_s9, 4  ;;  %p56_p0 = scmp.ne.s32.totalorder %s148_s0, %s55_s13  ;;  %s16_s10 = int_to_ptr.vmem [resolvable:$true] %s15_s10 }
   0x3   :  { %p59_p1 = scmp.lt.u32.totalorder %s55_s13, %s148_s0 }
   0x5   :  { %p61_p2 = pnand %p59_p1, %p56_p0 }
   0x7   :  { %64 = shalt.err (!%p61_p2)
}
   0x8   :  { %s65_s18 = scalar_lea.vmem %s16_s10, 256  ;;  %p70_p4 = scmp.lt.s32.totalorder %s16_s10, %s16_s10 }
   0x9   :  { %p66_p3 = scmp.ne.s32.totalorder %s16_s10, %s65_s18  ;;  %p71_p5 = scmp.lt.s32.totalorder %s65_s18, %s65_s18 }
   0xb   :  { %p72_p6 = por %p71_p5, %p70_p4 }
   0xd   :  { %p73_p7 = pnand %p72_p6, %p66_p3 }
   0xf   :  { %76 = shalt.err (!%p73_p7)
}
  0x10   :  { %18 = dma.hbm_to_vmem [thread:$0]  %s148_s0, 256, %s16_s10, [#allocation3]  }
  0x11   :  { %99 = dma.done.wait [#allocation3], 256  }
  0x12   :  { %100 = vsyncadd [#allocation3], 4294967040  ;;  %v104_v0 = vmov 0   ;;  %v26_v1 = vld [vmem:[%s149_s1] sm:$0xff]  ;;  %v25_v3 = vld [vmem:[#allocation2 + $0x8] sm:$0xff]  ;;  %s105_s23 = smov [#allocation5]  }
  0x13   :  { %54 = vset.pattern.permute.xlu0 %v104_v0  ;;  %v24_v2 = vld [vmem:[#allocation2] sm:$0xff]  ;;  %s42_s24 = sshll.u32 %s105_s23, 4  ;;  %s43_s24 = int_to_ptr.vmem [resolvable:$true] %s42_s24 }
  0x14   :  { %29 = vperm.xlu0 %54, %v26_v1   ;;  %s77_s0 = scalar_lea.vmem %s43_s24, 256  ;;  %p82_p9 = scmp.lt.s32.totalorder %s43_s24, %s43_s24 }
  0x15   :  { %p78_p8 = scmp.ne.s32.totalorder %s43_s24, %s77_s0  ;;  %p83_p10 = scmp.lt.s32.totalorder %s77_s0, %s77_s0 }
  0x17   :  { %p84_p11 = por %p83_p10, %p82_p9 }
  0x19   :  { %p85_p12 = pnand %p84_p11, %p78_p8 }
  0x93   :  { %v30_v4 = vpop.permute.xlu0 %29 }
  0x94   :  { %v32_v5 = vmul.f32 %v30_v4, %v24_v2  ;;  %v33_v6 = vmul.f32 %v30_v4, %v25_v3 }
  0x96   :  { %34 = vst [vmem:[#allocation5] sm:$0xff] %v32_v5  ;;  %35 = vst [vmem:[#allocation5 + $0x8] sm:$0xff] %v33_v6 }
  0x97   :  { %88 = shalt.err (!%p85_p12)
}
  0x98   :  { %s89_s26 = scalar_lea.hbm %s150_s2, 256 }
  0x99   :  { %p90_p13 = scmp.ne.s32.totalorder %s150_s2, %s89_s26  ;;  %p93_p0 = scmp.lt.u32.totalorder %s89_s26, %s150_s2 }
  0x9b   :  { %p95_p1 = pnand %p93_p0, %p90_p13 }
  0x9d   :  { %98 = shalt.err (!%p95_p1)
}
  0x9e   :  { %45 = dma.vmem_to_hbm [thread:$0]  %s43_s24, 256, %s150_s2, [#allocation4]  }
  0x9f   :  { %101 = dma.done.wait [#allocation4], 256  }
  0xa0   :  { %102 = vsyncadd [#allocation4], 4294967040 }
  0xa1   :  { %49 = vsyncpa [#allocation3], 1 }
  0xa2   :  { %50 = vsyncpa [#allocation4], 1 }

</bundles_post_ra>
